<compile_context>
chip_gen: v7x
topology: tpu7x:2x2x1
jax: 0.10.0
libtpu: 0.0.40
codegen_flags: <defaults>
</compile_context>

<pallas_src>
import jax
import jax.numpy as jnp
from jax.experimental import pallas as pl
from jax.experimental.pallas import tpu as pltpu

LANES = 128
MAX_TILE_ROWS = 4096      # (4096, 128) f32 block = 2 MiB per input per slot
MIN_TILES_FOR_SPLIT = 2   # only split across TensorCores if there is real work


def _chip_has_two_tensorcores() -> bool:
    """True on v7x-class chips (2 TensorCores/chip); v5e/v6e have 1 TC."""
    try:
        kind = jax.devices()[0].device_kind.lower()
    except Exception:
        return False
    return ("v7" in kind) or ("7x" in kind)


def _make_fea_loss_kernel(tile_rows, rows_total, tiles_per_part, acc_rows,
                          needs_mask):
    def reduce_rows(c):
        # Fold the (tile_rows, 128) contribution down to the vreg-shaped
        # (acc_rows, 128) accumulator: pure VPU adds, no cross-lane work.
        if acc_rows == tile_rows:
            return c
        return c.reshape(tile_rows // 8, 8, LANES).sum(axis=0)

    def kernel(fea_ref, tgt_ref, out_ref):
        i = pl.program_id(1)

        # out_ref is VMEM-resident across the "arbitrary" reduction axis:
        # it is the per-partition accumulator.  Zero it once per partition.
        @pl.when(i == 0)
        def _():
            out_ref[...] = jnp.zeros_like(out_ref)

        f = fea_ref[...].astype(jnp.float32)
        t = tgt_ref[...].astype(jnp.float32)

        def contribution():
            diff = f - t
            # diff^2 * {0,1} is already non-negative -> torch.abs is a no-op.
            return jnp.where(jnp.logical_or(f > 0, t > 0), diff * diff, 0.0)

        if needs_mask:
            p = pl.program_id(0)
            blk = p * tiles_per_part + i            # nominal block index
            limit = rows_total - blk * tile_rows    # valid rows in this block

            @pl.when(limit >= tile_rows)            # fully in-range block
            def _():
                out_ref[...] += reduce_rows(contribution())

            @pl.when(limit < tile_rows)             # tail / clamped-OOB block
            def _():
                row = jax.lax.broadcasted_iota(jnp.int32, (tile_rows, LANES), 0)
                c = jnp.where(row < limit, contribution(), 0.0)
                out_ref[...] += reduce_rows(c)
        else:
            out_ref[...] += reduce_rows(contribution())

    return kernel


def fea_loss(fea, target_fea, *, max_tile_rows=MAX_TILE_ROWS, parts=None):
    assert fea.shape == target_fea.shape
    n = fea.size
    if n == 0:
        return jnp.zeros((), jnp.float32)

    f = fea.reshape(-1)
    t = target_fea.reshape(-1)

    # Minimal padding: only to a multiple of 128 lanes, only when required.
    # Padded entries are zero for both inputs -> mask False -> zero contribution.
    # TODO(synk): a fully pad-free path for n % 128 != 0 needs a 1-D /
    # tail-lane-masked layout; it is a no-op for the NCHW shapes this loss sees.
    pad = (-n) % LANES
    if pad:
        f = jnp.pad(f, (0, pad))
        t = jnp.pad(t, (0, pad))

    rows = (n + pad) // LANES
    f2 = f.reshape(rows, LANES)
    t2 = t.reshape(rows, LANES)

    # Tile sizing: full extent for small inputs, (MAX_TILE_ROWS, 128) otherwise.
    tile_rows = rows if rows <= max_tile_rows else max_tile_rows
    n_tiles = -(-rows // tile_rows)

    # 2-way split only where it buys anything (v7x has 2 TCs; v5e/v6e have 1,
    # where the split is just a serial loop + extra masking + redundant DMA).
    if parts is None:
        parts = 2 if (_chip_has_two_tensorcores()
                      and n_tiles >= MIN_TILES_FOR_SPLIT) else 1
    tiles_per_part = -(-n_tiles // parts)

    has_tail = n_tiles * tile_rows != rows            # partial last block
    has_oob = parts * tiles_per_part != n_tiles       # clamped, fully-masked blk
    needs_mask = has_tail or has_oob

    # vreg-shaped accumulator whenever the tile is sublane-aligned.
    acc_rows = 8 if tile_rows % 8 == 0 else tile_rows

    def in_map(p, i):
        blk = p * tiles_per_part + i
        if has_oob:
            # Clamp fully-out-of-range blocks onto a valid block; the in-kernel
            # row mask (computed from the *nominal* index) zeroes them.
            blk = jnp.minimum(blk, n_tiles - 1)
        return (blk, 0)

    kernel = _make_fea_loss_kernel(tile_rows, rows, tiles_per_part, acc_rows,
                                   needs_mask)

    partials = pl.pallas_call(
        kernel,
        out_shape=jax.ShapeDtypeStruct((parts, acc_rows, LANES), jnp.float32),
        grid_spec=pltpu.PrefetchScalarGridSpec(
            num_scalar_prefetch=0,
            grid=(parts, tiles_per_part),
            in_specs=[
                pl.BlockSpec((tile_rows, LANES), in_map),
                pl.BlockSpec((tile_rows, LANES), in_map),
            ],
            # Lane-dense per-partition partial; the tiny cross-lane reduce
            # happens once in the wrapper.
            out_specs=pl.BlockSpec((None, acc_rows, LANES),
                                   lambda p, i: (p, 0, 0)),
        ),
        compiler_params=pltpu.CompilerParams(
            dimension_semantics=("parallel", "arbitrary"),
            vmem_limit_bytes=32 * 1024 * 1024,
        ),
    )(f2, t2)

    return jnp.sum(partials)


def fea_loss_ref(fea, target_fea):
    diff = fea - target_fea
    mask = jnp.logical_or(fea > 0, target_fea > 0).astype(fea.dtype)
    return jnp.sum(jnp.abs(diff * diff * mask))


if __name__ == "__main__":
    key = jax.random.PRNGKey(0)

    # 1) Small NCHW feature maps, as the KD feature loss expects.
    k1, k2 = jax.random.split(key)
    fea = jax.random.normal(k1, (2, 4, 16, 16), dtype=jnp.float32)
    tgt = jax.random.normal(k2, (2, 4, 16, 16), dtype=jnp.float32)
    out = fea_loss(fea, tgt)
    jax.block_until_ready(out)
    ref = fea_loss_ref(fea, tgt)
    assert jnp.allclose(out, ref, rtol=1e-5, atol=1e-5), (out, ref)

    # 2) Guard the multi-tile / tail-mask / clamped-OOB-block path with a tiny
    #    tile and a forced 2-way partition (odd n_tiles).
    k3, k4 = jax.random.split(k2)
    fea2 = jax.random.normal(k3, (2, 4, 16, 18), dtype=jnp.float32)
    tgt2 = jax.random.normal(k4, (2, 4, 16, 18), dtype=jnp.float32)
    out2 = fea_loss(fea2, tgt2, max_tile_rows=8, parts=2)
    jax.block_until_ready(out2)
    ref2 = fea_loss_ref(fea2, tgt2)
    assert jnp.allclose(out2, ref2, rtol=1e-5, atol=1e-5), (out2, ref2)

    # 3) Guard the n % 128 != 0 (minimal pad) + non-sublane-aligned tiny tile.
    k5, k6 = jax.random.split(k4)
    fea3 = jax.random.normal(k5, (2, 3, 7, 7), dtype=jnp.float32)
    tgt3 = jax.random.normal(k6, (2, 3, 7, 7), dtype=jnp.float32)
    out3 = fea_loss(fea3, tgt3)
    jax.block_until_ready(out3)
    ref3 = fea_loss_ref(fea3, tgt3)
    assert jnp.allclose(out3, ref3, rtol=1e-5, atol=1e-5), (out3, ref3)

    print("KERNEL_OK")
</pallas_src>

<mosaic_0001>
module attributes {stable_mosaic.version = 11 : i64} {
  func.func @kernel(%arg0: i32, %arg1: i32, %arg2: memref<16x128xf32, #tpu.memory_space<vmem>>, %arg3: memref<16x128xf32, #tpu.memory_space<vmem>>, %arg4: memref<1x8x128xf32, #tpu.memory_space<vmem>>) attributes {dimension_semantics = [#tpu.dimension_semantics<parallel>, #tpu.dimension_semantics<arbitrary>], iteration_bounds = array<i64: 1, 1>, scalar_prefetch = 0 : i64, scratch_operands = 0 : i64, tpu.core_type = #tpu.core_type<tc>, window_params = [{transform_indices = @transform_0, window_bounds = array<i64: 16, 128>}, {transform_indices = @transform_1, window_bounds = array<i64: 16, 128>}, {transform_indices = @transform_2, window_bounds = array<i64: 1, 8, 128>}]} {
    %c0_i32 = arith.constant 0 : i32
    %0 = arith.cmpi eq, %arg1, %c0_i32 : i32
    %1 = arith.extui %0 : i1 to i32
    %c0_i32_0 = arith.constant 0 : i32
    %2 = arith.cmpi ne, %1, %c0_i32_0 : i32
    scf.if %2 {
      %cst_13 = arith.constant 0.000000e+00 : f32
      %22 = vector.broadcast %cst_13 : f32 to vector<8x128xf32>
      %c0_14 = arith.constant 0 : index
      %c0_15 = arith.constant 0 : index
      %c0_16 = arith.constant 0 : index
      %23 = vector.load %arg4[%c0_14, %c0_15, %c0_16] : memref<1x8x128xf32, #tpu.memory_space<vmem>>, vector<1x8x128xf32>
      %24 = vector.shape_cast %23 : vector<1x8x128xf32> to vector<8x128xf32>
      %25 = vector.shape_cast %22 : vector<8x128xf32> to vector<1x8x128xf32>
      tpu.vector_store %arg4[%c0_14, %c0_15, %c0_16], %25 {strides = array<i32>} : memref<1x8x128xf32, #tpu.memory_space<vmem>>, vector<1x8x128xf32>,
    } else {
    }
    %c0 = arith.constant 0 : index
    %c0_1 = arith.constant 0 : index
    %3 = vector.load %arg2[%c0, %c0_1] : memref<16x128xf32, #tpu.memory_space<vmem>>, vector<16x128xf32>
    %c0_2 = arith.constant 0 : index
    %c0_3 = arith.constant 0 : index
    %4 = vector.load %arg3[%c0_2, %c0_3] : memref<16x128xf32, #tpu.memory_space<vmem>>, vector<16x128xf32>
    %c0_4 = arith.constant 0 : index
    %c0_5 = arith.constant 0 : index
    %c0_6 = arith.constant 0 : index
    %5 = vector.load %arg4[%c0_4, %c0_5, %c0_6] : memref<1x8x128xf32, #tpu.memory_space<vmem>>, vector<1x8x128xf32>
    %6 = vector.shape_cast %5 : vector<1x8x128xf32> to vector<8x128xf32>
    %7 = arith.subf %3, %4 : vector<16x128xf32>
    %cst = arith.constant 0.000000e+00 : f32
    %8 = vector.broadcast %cst : f32 to vector<16x128xf32>
    %9 = arith.cmpf ogt, %3, %8 : vector<16x128xf32>
    %cst_7 = arith.constant 0.000000e+00 : f32
    %10 = vector.broadcast %cst_7 : f32 to vector<16x128xf32>
    %11 = arith.cmpf ogt, %4, %10 : vector<16x128xf32>
    %12 = arith.ori %9, %11 : vector<16x128xi1>
    %13 = arith.mulf %7, %7 : vector<16x128xf32>
    %cst_8 = arith.constant 0.000000e+00 : f32
    %14 = vector.broadcast %cst_8 : f32 to vector<16x128xf32>
    %15 = arith.select %12, %13, %14 : vector<16x128xi1>, vector<16x128xf32>
    %16 = vector.shape_cast %15 : vector<16x128xf32> to vector<2x8x128xf32>
    %cst_9 = arith.constant dense<0.000000e+00> : vector<8x128xf32>
    %17 = vector.multi_reduction <add>, %16, %cst_9 [0] : vector<2x8x128xf32> to vector<8x128xf32>
    %18 = arith.addf %6, %17 : vector<8x128xf32>
    %c0_10 = arith.constant 0 : index
    %c0_11 = arith.constant 0 : index
    %c0_12 = arith.constant 0 : index
    %19 = vector.load %arg4[%c0_10, %c0_11, %c0_12] : memref<1x8x128xf32, #tpu.memory_space<vmem>>, vector<1x8x128xf32>
    %20 = vector.shape_cast %19 : vector<1x8x128xf32> to vector<8x128xf32>
    %21 = vector.shape_cast %18 : vector<8x128xf32> to vector<1x8x128xf32>
    tpu.vector_store %arg4[%c0_10, %c0_11, %c0_12], %21 {strides = array<i32>} : memref<1x8x128xf32, #tpu.memory_space<vmem>>, vector<1x8x128xf32>,
    return
  }
  func.func @transform_0(%arg0: i32, %arg1: i32) -> (i32, i32) {
    %c1_i32 = arith.constant 1 : i32
    %0 = arith.muli %arg0, %c1_i32 : i32
    %1 = arith.addi %0, %arg1 : i32
    %c0_i32 = arith.constant 0 : i32
    %c0_i32_0 = arith.constant 0 : i32
    return %1, %c0_i32 : i32, i32
  }
  func.func @transform_1(%arg0: i32, %arg1: i32) -> (i32, i32) {
    %c1_i32 = arith.constant 1 : i32
    %0 = arith.muli %arg0, %c1_i32 : i32
    %1 = arith.addi %0, %arg1 : i32
    %c0_i32 = arith.constant 0 : i32
    %c0_i32_0 = arith.constant 0 : i32
    return %1, %c0_i32 : i32, i32
  }
  func.func @transform_2(%arg0: i32, %arg1: i32) -> (i32, i32, i32) {
    %c0_i32 = arith.constant 0 : i32
    %c0_i32_0 = arith.constant 0 : i32
    %c0_i32_1 = arith.constant 0 : i32
    return %arg0, %c0_i32, %c0_i32_0 : i32, i32, i32
  }
}

</mosaic_0001>

<bundles_post_ra>
// kernel: tpu_custom_call.1
= control target key start
LH: loop header
LB: loop body
LE: loop exit
PB: predicated region body
PF: predicated region fallthrough
CT: control target
= control target key end

     0   :  { %7 = vsyncpa [#allocation3], 0  ;;  %s227_s0 = inlined_call_operand.hbm [shape: f32[16,128], index: 0, kind: input, shape index: {}]   ;;  %s228_s1 = inlined_call_operand.hbm [shape: f32[16,128], index: 1, kind: input, shape index: {}]   ;;  %s229_s2 = inlined_call_operand.hbm [shape: f32[1,8,128], index: 2, kind: output, shape index: {}]  }
   0x1   :  { %8 = vsyncpa [#allocation6], 0 }
   0x2   :  { %9 = vsyncpa [#allocation4], 0  ;;  %s171_s9 = smov [#allocation2]   ;;  %s99_s13 = scalar_lea.hbm %s227_s0, 256 }
   0x3   :  { %s19_s10 = sshll.u32 %s171_s9, 4  ;;  %p100_p0 = scmp.ne.s32.totalorder %s227_s0, %s99_s13  ;;  %s20_s10 = int_to_ptr.vmem [resolvable:$true] %s19_s10 }
   0x4   :  { %p103_p1 = scmp.lt.u32.totalorder %s99_s13, %s227_s0 }
   0x6   :  { %p105_p2 = pnand %p103_p1, %p100_p0 }
   0x8   :  { %108 = shalt.err (!%p105_p2)
}
   0x9   :  { %s109_s18 = scalar_lea.vmem %s20_s10, 256  ;;  %p114_p4 = scmp.lt.s32.totalorder %s20_s10, %s20_s10 }
   0xa   :  { %p110_p3 = scmp.ne.s32.totalorder %s20_s10, %s109_s18  ;;  %p115_p5 = scmp.lt.s32.totalorder %s109_s18, %s109_s18 }
   0xc   :  { %p116_p6 = por %p115_p5, %p114_p4 }
   0xe   :  { %p117_p7 = pnand %p116_p6, %p110_p3 }
  0x10   :  { %120 = shalt.err (!%p117_p7)
}
  0x11   :  { %s172_s19 = smov 128   ;;  %s173_s20 = smov 8  }
  0x12   :  { %25 = dma.hbm_to_vmem [thread:$0]  %s227_s0, 256, %s20_s10, [#allocation3], %s172_s19, %s172_s19, %s173_s20  }
  0x13   :  { %s174_s23 = smov [#allocation5]   ;;  %s121_s27 = scalar_lea.hbm %s228_s1, 256 }
  0x14   :  { %s35_s24 = sshll.u32 %s174_s23, 4  ;;  %p122_p8 = scmp.ne.s32.totalorder %s228_s1, %s121_s27  ;;  %s36_s24 = int_to_ptr.vmem [resolvable:$true] %s35_s24 }
  0x15   :  { %p125_p9 = scmp.lt.u32.totalorder %s121_s27, %s228_s1 }
  0x17   :  { %p127_p10 = pnand %p125_p9, %p122_p8 }
  0x19   :  { %130 = shalt.err (!%p127_p10)
}
  0x1a   :  { %s131_s4 = scalar_lea.vmem %s36_s24, 256  ;;  %p136_p12 = scmp.lt.s32.totalorder %s36_s24, %s36_s24 }
  0x1b   :  { %p132_p11 = scmp.ne.s32.totalorder %s36_s24, %s131_s4  ;;  %p137_p13 = scmp.lt.s32.totalorder %s131_s4, %s131_s4 }
  0x1d   :  { %p138_p0 = por %p137_p13, %p136_p12 }
  0x1f   :  { %p139_p1 = pnand %p138_p0, %p132_p11 }
  0x21   :  { %142 = shalt.err (!%p139_p1)
}
  0x22   :  { %41 = dma.hbm_to_vmem [thread:$0]  %s228_s1, 256, %s36_s24, [#allocation6], %s172_s19, %s172_s19, %s173_s20  }
  0x23   :  { %165 = dma.done.wait [#allocation3], 256  }
  0x24   :  { %166 = vsyncadd [#allocation3], 4294967040 }
  0x25   :  { %167 = dma.done.wait [#allocation6], 256  }
  0x26   :  { %168 = vsyncadd [#allocation6], 4294967040  ;;  %v57_v0 = vld [vmem:[#allocation2] sm:$0xff]  ;;  %v58_v1 = vld [vmem:[#allocation2 + $0x8] sm:$0xff]  ;;  %s175_s1 = smov [#allocation7]  }
  0x27   :  { %v59_v2 = vld [vmem:[#allocation5] sm:$0xff]  ;;  %v60_v3 = vld [vmem:[#allocation5 + $0x8] sm:$0xff]  ;;  %vm64_vm0 = vcmp.gt.f32.partialorder %v57_v0, 0.0  ;;  %vm65_vm1 = vcmp.gt.f32.partialorder %v58_v1, 0.0  ;;  %s83_s6 = sshll.u32 %s175_s1, 4  ;;  %s84_s6 = int_to_ptr.vmem [resolvable:$true] %s83_s6 }
  0x28   :  { %v62_v4 = vsub.f32 %v57_v0, %v59_v2  ;;  %vm66_vm2 = vcmp.gt.f32.partialorder %v59_v2, 0.0  ;;  %v63_v5 = vsub.f32 %v58_v1, %v60_v3  ;;  %vm67_vm3 = vcmp.gt.f32.partialorder %v60_v3, 0.0  ;;  %s143_s7 = scalar_lea.vmem %s84_s6, 128  ;;  %p148_p3 = scmp.lt.s32.totalorder %s84_s6, %s84_s6 }
  0x29   :  { %vm68_vm4 = vmor %vm64_vm0, %vm66_vm2  ;;  %p144_p2 = scmp.ne.s32.totalorder %s84_s6, %s143_s7  ;;  %p149_p4 = scmp.lt.s32.totalorder %s143_s7, %s143_s7 }
  0x2a   :  { %vm69_vm5 = vmor %vm65_vm1, %vm67_vm3  ;;  %v70_v6 = vmul.f32 %v62_v4, %v62_v4  ;;  %v71_v7 = vmul.f32 %v63_v5, %v63_v5 }
  0x2b   :  { %p150_p5 = por %p149_p4, %p148_p3 }
  0x2c   :  { %v72_v8 = vsel %vm68_vm4, %v70_v6, 0.0  ;;  %v73_v9 = vsel %vm69_vm5, %v71_v7, 0.0 }
  0x2d   :  { %v74_v10 = vadd.f32 %v73_v9, %v72_v8  ;;  %p151_p6 = pnand %p150_p5, %p144_p2 }
  0x2f   :  { %76 = vst [vmem:[#allocation7] sm:$0xff] %v74_v10 }
  0x30   :  { %154 = shalt.err (!%p151_p6)
}
  0x31   :  { %s155_s10 = scalar_lea.hbm %s229_s2, 128 }
  0x32   :  { %p156_p7 = scmp.ne.s32.totalorder %s229_s2, %s155_s10  ;;  %p159_p8 = scmp.lt.u32.totalorder %s155_s10, %s229_s2 }
  0x34   :  { %p161_p9 = pnand %p159_p8, %p156_p7 }
  0x36   :  { %164 = shalt.err (!%p161_p9)
}
  0x37   :  { %86 = dma.vmem_to_hbm [thread:$0]  %s84_s6, 128, %s229_s2, [#allocation4]  }
  0x38   :  { %169 = dma.done.wait [#allocation4], 128  }
  0x39   :  { %170 = vsyncadd [#allocation4], 4294967168 }
  0x3a   :  { %90 = vsyncpa [#allocation3], 1 }
  0x3b   :  { %91 = vsyncpa [#allocation6], 1 }
  0x3c   :  { %92 = vsyncpa [#allocation4], 1 }

</bundles_post_ra>
